<compile_context>
chip_gen: v5e
topology: v5e:2x2
jax: 0.10.0
libtpu: 0.0.40
codegen_flags: <defaults>
</compile_context>

<pallas_src>
import functools

import jax
import jax.numpy as jnp
from jax.experimental import pallas as pl
from jax.experimental.pallas import tpu as pltpu


def _round_up(x, m):
    return (x + m - 1) // m * m


def _pick_tile(n_padded, cap):
    """Largest power-of-two multiple of 128 that divides n_padded and is <= cap."""
    t = 128
    while t * 2 <= cap and n_padded % (t * 2) == 0:
        t *= 2
    return t


def _spmm_kernel(graph_ref, emb_ref, out_ref, acc_ref):
    """out[i] = sum_k graph[i, k] @ emb[k]   (K-tiled, f32 accumulation)."""
    k = pl.program_id(1)

    @pl.when(k == 0)
    def _():
        acc_ref[...] = jnp.zeros_like(acc_ref)

    acc_ref[...] += jnp.dot(graph_ref[...], emb_ref[...],
                            preferred_element_type=jnp.float32)

    @pl.when(k == pl.num_programs(1) - 1)
    def _():
        out_ref[...] = acc_ref[...].astype(out_ref.dtype)


def _spmm_noise_kernel(graph_ref, emb_ref, noise_ref, out_ref, acc_ref, *, eps):
    """Same as _spmm_kernel, plus XSimGCL noise applied only after the full
    reduction:  out += sign(out) * l2_normalize(noise, -1) * eps."""
    k = pl.program_id(1)

    @pl.when(k == 0)
    def _():
        acc_ref[...] = jnp.zeros_like(acc_ref)

    acc_ref[...] += jnp.dot(graph_ref[...], emb_ref[...],
                            preferred_element_type=jnp.float32)

    @pl.when(k == pl.num_programs(1) - 1)
    def _():
        acc = acc_ref[...]
        u = noise_ref[...].astype(jnp.float32)
        # F.normalize(u, dim=-1) == u * rsqrt(max(sum(u*u), 1e-24)); rsqrt on EUP.
        inv_norm = jax.lax.rsqrt(
            jnp.maximum(jnp.sum(u * u, axis=-1, keepdims=True), 1e-24))
        out_ref[...] = (acc + jnp.sign(acc) * (u * inv_norm) * eps
                        ).astype(out_ref.dtype)


def propagate_layer(graph_c, emb_c, noise, *, eps, tm, tk):
    """new_emb = graph @ emb (+ optional XSimGCL noise); K-tiled over columns."""
    Np, Dp = emb_c.shape
    assert graph_c.shape == (Np, Np)
    assert Np % tm == 0 and Np % tk == 0 and Dp % 128 == 0

    in_specs = [
        pl.BlockSpec((tm, tk), lambda i, k: (i, k)),   # row x K tile of graph
        pl.BlockSpec((tk, Dp), lambda i, k: (k, 0)),   # K tile of emb
    ]
    args = [graph_c, emb_c]
    if noise is None:
        kernel = _spmm_kernel
    else:
        in_specs.append(pl.BlockSpec((tm, Dp), lambda i, k: (i, 0)))
        args.append(noise)
        kernel = functools.partial(_spmm_noise_kernel, eps=float(eps))

    return pl.pallas_call(
        kernel,
        out_shape=jax.ShapeDtypeStruct((Np, Dp), jnp.float32),
        grid_spec=pltpu.PrefetchScalarGridSpec(
            num_scalar_prefetch=0,
            grid=(Np // tm, Np // tk),                 # reduction axis last
            in_specs=in_specs,
            out_specs=pl.BlockSpec((tm, Dp), lambda i, k: (i, 0)),
            scratch_shapes=[pltpu.VMEM((tm, Dp), jnp.float32)],
        ),
        compiler_params=pltpu.CompilerParams(
            dimension_semantics=("parallel", "arbitrary"),
            vmem_limit_bytes=32 * 1024 * 1024,
        ),
    )(*args)


def xsimgcl_forward(perturbed, all_users, all_items, graph, *,
                    eps, layer_cl, layers, seed=0,
                    tm_max=256, tk_max=512, compute_dtype=jnp.bfloat16):
    """JAX/Pallas equivalent of xsimgcl_encoder.forward."""
    num_users = all_users.shape[0]
    all_emb = jnp.concatenate([all_users, all_items], axis=0).astype(jnp.float32)
    N, D = all_emb.shape

    # Lane-dense / MXU-aligned padding (exact: padded rows/cols are zero).
    Np = _round_up(N, 128)
    Dp = _round_up(D, 128)
    tm = _pick_tile(Np, tm_max)
    tk = _pick_tile(Np, tk_max)

    emb_p = jnp.pad(all_emb, ((0, Np - N), (0, Dp - D)))
    graph_p = jnp.pad(graph.astype(jnp.float32),
                      ((0, Np - N), (0, Np - N))).astype(compute_dtype)

    key = jax.random.PRNGKey(seed)
    e = emb_p
    emb_sum = jnp.zeros_like(emb_p)        # running mean accumulator
    embs_cl = emb_p
    for layer in range(layers):
        noise = None
        if perturbed:
            # TODO(synk): torch.rand_like's RNG stream is not reproduced
            # bit-for-bit; same distribution/semantics (uniform -> L2 normalize).
            u = jax.random.uniform(jax.random.fold_in(key, layer), (N, D),
                                   dtype=jnp.float32)
            noise = jnp.pad(u, ((0, Np - N), (0, Dp - D)))
        e = propagate_layer(graph_p, e.astype(compute_dtype), noise,
                            eps=eps, tm=tm, tk=tk)
        emb_sum = emb_sum + e
        if layer == layer_cl:
            embs_cl = e

    mean_emb = (emb_sum / layers)[:N, :D]
    embs_cl = embs_cl[:N, :D]
    user_all, item_all = mean_emb[:num_users], mean_emb[num_users:]
    user_cl, item_cl = embs_cl[:num_users], embs_cl[num_users:]
    if perturbed:
        return user_all, item_all, user_cl, item_cl
    return user_all, item_all


if __name__ == "__main__":
    key = jax.random.PRNGKey(0)
    num_users, num_items, dim = 16, 48, 32
    layers, layer_cl, eps = 3, 1, 0.2
    N = num_users + num_items

    ku, ki, kg = jax.random.split(key, 3)
    all_users = 0.1 * jax.random.normal(ku, (num_users, dim), dtype=jnp.float32)
    all_items = 0.1 * jax.random.normal(ki, (num_items, dim), dtype=jnp.float32)

    # Deterministic LightGCN-style normalized bipartite adjacency (dense
    # stand-in for the torch sparse graph).
    r = (jax.random.uniform(kg, (num_users, num_items)) < 0.2).astype(jnp.float32)
    adj = jnp.zeros((N, N), jnp.float32)
    adj = adj.at[:num_users, num_users:].set(r)
    adj = adj.at[num_users:, :num_users].set(r.T)
    deg = jnp.maximum(adj.sum(axis=1), 1.0)
    d_inv_sqrt = 1.0 / jnp.sqrt(deg)
    graph = adj * d_inv_sqrt[:, None] * d_inv_sqrt[None, :]

    # Pure-JAX reference (perturbed=False is deterministic).
    emb = jnp.concatenate([all_users, all_items], axis=0)
    e_ref, ref_embs = emb, []
    for _ in range(layers):
        e_ref = graph @ e_ref
        ref_embs.append(e_ref)
    ref_mean = jnp.mean(jnp.stack(ref_embs, axis=1), axis=1)

    # --- f32 path: tight numerical check against the reference ---
    ua, ia = xsimgcl_forward(False, all_users, all_items, graph,
                             eps=eps, layer_cl=layer_cl, layers=layers,
                             compute_dtype=jnp.float32)
    jax.block_until_ready((ua, ia))
    assert jnp.allclose(ua, ref_mean[:num_users], atol=1e-5), "user_all mismatch (f32)"
    assert jnp.allclose(ia, ref_mean[num_users:], atol=1e-5), "item_all mismatch (f32)"

    # --- bf16 fast path (default): halves the dominant (N, N) graph stream ---
    ua_b, ia_b = xsimgcl_forward(False, all_users, all_items, graph,
                                 eps=eps, layer_cl=layer_cl, layers=layers)
    jax.block_until_ready((ua_b, ia_b))
    assert jnp.allclose(ua_b, ref_mean[:num_users], atol=5e-3), "user_all mismatch (bf16)"
    assert jnp.allclose(ia_b, ref_mean[num_users:], atol=5e-3), "item_all mismatch (bf16)"

    # --- perturbed=True: noise applied in the kernel finalize step ---
    ua2, ia2, ucl, icl = xsimgcl_forward(True, all_users, all_items, graph,
                                         eps=eps, layer_cl=layer_cl,
                                         layers=layers, seed=123)
    jax.block_until_ready((ua2, ia2, ucl, icl))
    assert ua2.shape == (num_users, dim) and ia2.shape == (num_items, dim)
    assert ucl.shape == (num_users, dim) and icl.shape == (num_items, dim)
    assert bool(jnp.all(jnp.isfinite(ua2))) and bool(jnp.all(jnp.isfinite(icl)))
    # The perturbation must actually move the (non-isolated) embeddings.
    assert not jnp.allclose(ua2, ref_mean[:num_users], atol=1e-4)

    print("KERNEL_OK")
</pallas_src>

<mosaic_0001>
module attributes {stable_mosaic.version = 11 : i64} {
  func.func @_spmm_kernel(%arg0: i32, %arg1: i32, %arg2: memref<128x128xf32, #tpu.memory_space<vmem>>, %arg3: memref<128x128xf32, #tpu.memory_space<vmem>>, %arg4: memref<128x128xf32, #tpu.memory_space<vmem>>, %arg5: memref<128x128xf32, #tpu.memory_space<vmem>>) attributes {dimension_semantics = [#tpu.dimension_semantics<parallel>, #tpu.dimension_semantics<arbitrary>], iteration_bounds = array<i64: 1, 1>, scalar_prefetch = 0 : i64, scratch_operands = 1 : i64, tpu.core_type = #tpu.core_type<tc>, window_params = [{transform_indices = @transform_0, window_bounds = array<i64: 128, 128>}, {transform_indices = @transform_1, window_bounds = array<i64: 128, 128>}, {transform_indices = @transform_2, window_bounds = array<i64: 128, 128>}]} {
    %c0_i32 = arith.constant 0 : i32
    %0 = arith.cmpi eq, %arg1, %c0_i32 : i32
    %1 = arith.extui %0 : i1 to i32
    %c0_i32_0 = arith.constant 0 : i32
    %2 = arith.cmpi ne, %1, %c0_i32_0 : i32
    scf.if %2 {
      %cst_10 = arith.constant 0.000000e+00 : f32
      %12 = vector.broadcast %cst_10 : f32 to vector<128x128xf32>
      %c0_11 = arith.constant 0 : index
      %c0_12 = arith.constant 0 : index
      %13 = vector.load %arg5[%c0_11, %c0_12] : memref<128x128xf32, #tpu.memory_space<vmem>>, vector<128x128xf32>
      tpu.vector_store %arg5[%c0_11, %c0_12], %12 {strides = array<i32>} : memref<128x128xf32, #tpu.memory_space<vmem>>, vector<128x128xf32>,
    } else {
    }
    %c0 = arith.constant 0 : index
    %c0_1 = arith.constant 0 : index
    %3 = vector.load %arg5[%c0, %c0_1] : memref<128x128xf32, #tpu.memory_space<vmem>>, vector<128x128xf32>
    %c0_2 = arith.constant 0 : index
    %c0_3 = arith.constant 0 : index
    %4 = vector.load %arg2[%c0_2, %c0_3] : memref<128x128xf32, #tpu.memory_space<vmem>>, vector<128x128xf32>
    %c0_4 = arith.constant 0 : index
    %c0_5 = arith.constant 0 : index
    %5 = vector.load %arg3[%c0_4, %c0_5] : memref<128x128xf32, #tpu.memory_space<vmem>>, vector<128x128xf32>
    %cst = arith.constant dense<0.000000e+00> : vector<128x128xf32>
    %6 = tpu.matmul %4, %5, %cst {dimension_numbers = #tpu.dot_dimension_numbers<[1], [0], [0], [1], [0, 0, 1, 1], [], []>} : vector<128x128xf32>, vector<128x128xf32>, vector<128x128xf32> -> vector<128x128xf32>
    %7 = arith.addf %3, %6 : vector<128x128xf32>
    %c0_6 = arith.constant 0 : index
    %c0_7 = arith.constant 0 : index
    %8 = vector.load %arg5[%c0_6, %c0_7] : memref<128x128xf32, #tpu.memory_space<vmem>>, vector<128x128xf32>
    tpu.vector_store %arg5[%c0_6, %c0_7], %7 {strides = array<i32>} : memref<128x128xf32, #tpu.memory_space<vmem>>, vector<128x128xf32>,
    %c0_i32_8 = arith.constant 0 : i32
    %9 = arith.cmpi eq, %arg1, %c0_i32_8 : i32
    %10 = arith.extui %9 : i1 to i32
    %c0_i32_9 = arith.constant 0 : i32
    %11 = arith.cmpi ne, %10, %c0_i32_9 : i32
    scf.if %11 {
      %c0_10 = arith.constant 0 : index
      %c0_11 = arith.constant 0 : index
      %12 = vector.load %arg5[%c0_10, %c0_11] : memref<128x128xf32, #tpu.memory_space<vmem>>, vector<128x128xf32>
      %c0_12 = arith.constant 0 : index
      %c0_13 = arith.constant 0 : index
      %13 = vector.load %arg4[%c0_12, %c0_13] : memref<128x128xf32, #tpu.memory_space<vmem>>, vector<128x128xf32>
      tpu.vector_store %arg4[%c0_12, %c0_13], %12 {strides = array<i32>} : memref<128x128xf32, #tpu.memory_space<vmem>>, vector<128x128xf32>,
    } else {
    }
    return
  }
  func.func @transform_0(%arg0: i32, %arg1: i32) -> (i32, i32) {
    %c0_i32 = arith.constant 0 : i32
    return %arg0, %arg1 : i32, i32
  }
  func.func @transform_1(%arg0: i32, %arg1: i32) -> (i32, i32) {
    %c0_i32 = arith.constant 0 : i32
    %c0_i32_0 = arith.constant 0 : i32
    return %arg1, %c0_i32 : i32, i32
  }
  func.func @transform_2(%arg0: i32, %arg1: i32) -> (i32, i32) {
    %c0_i32 = arith.constant 0 : i32
    %c0_i32_0 = arith.constant 0 : i32
    return %arg0, %c0_i32 : i32, i32
  }
}

</mosaic_0001>

<bundles_post_ra>
// kernel: tpu_custom_call.1
= control target key start
LH: loop header
LB: loop body
LE: loop exit
PB: predicated region body
PF: predicated region fallthrough
CT: control target
= control target key end

     0   :  { %7 = vsyncpa [#allocation4], 0  ;;  %s433_s0 = inlined_call_operand.hbm [shape: f32[128,128], index: 0, kind: input, shape index: {}]   ;;  %s434_s1 = inlined_call_operand.hbm [shape: f32[128,128], index: 1, kind: input, shape index: {}]   ;;  %s435_s2 = inlined_call_operand.hbm [shape: f32[128,128], index: 2, kind: output, shape index: {}]  }
   0x1   :  { %8 = vsyncpa [#allocation7], 0 }
   0x2   :  { %9 = vsyncpa [#allocation5], 0  ;;  %s14_s11 = sshll.u32 %s433_s0, 4  ;;  %s395_s12 = smov [#allocation3]   ;;  %s15_s11 = int_to_ptr.hbm [resolvable:$true] %s14_s11 }
   0x3   :  { %s16_s13 = sshll.u32 %s395_s12, 4  ;;  %s27_s16 = sshll.u32 %s434_s1, 4  ;;  %s17_s13 = int_to_ptr.vmem [resolvable:$true] %s16_s13  ;;  %s28_s16 = int_to_ptr.hbm [resolvable:$true] %s27_s16 }
   0x4   :  { %s396_s17 = smov 128   ;;  %s397_s18 = smov 8  }
   0x5   :  { %22 = dma.hbm_to_vmem [thread:$0]  %s15_s11, 2048, %s17_s13, [#allocation4], %s396_s17, %s396_s17, %s397_s18  }
   0x6   :  { %s398_s19 = smov [#allocation6]  }
   0x7   :  { %s29_s20 = sshll.u32 %s398_s19, 4  ;;  %s30_s20 = int_to_ptr.vmem [resolvable:$true] %s29_s20 }
   0x8   :  { %35 = dma.hbm_to_vmem [thread:$0]  %s28_s16, 2048, %s30_s20, [#allocation7], %s396_s17, %s396_s17, %s397_s18  }
   0x9   :  { %389 = dma.done.wait [#allocation4], 2048  }
   0xa   :  { %390 = vsyncadd [#allocation4], 4294965248 }
   0xb   :  { %391 = dma.done.wait [#allocation7], 2048  }
   0xc   :  { %392 = vsyncadd [#allocation7], 4294965248  ;;  %v111_v0 = vld [vmem:[#allocation6 + $0x78] sm:$0xff]  ;;  %v110_v1 = vld [vmem:[#allocation6 + $0x70] sm:$0xff]  ;;  %s399_s0 = smov [#allocation8]   ;;  %s250_s23 = sshll.u32 %s435_s2, 4  ;;  %s251_s23 = int_to_ptr.hbm [resolvable:$true] %s250_s23 }
   0xd   :  { %265 = vmatpush.msra.mxu2 %v111_v0  ;;  %266 = vmatpush.msra.mxu3 %v111_v0  ;;  %v109_v2 = vld [vmem:[#allocation6 + $0x68] sm:$0xff]  ;;  %v108_v3 = vld [vmem:[#allocation6 + $0x60] sm:$0xff]  ;;  %v107_v4 = vld [vmem:[#allocation6 + $0x58] sm:$0xff]  ;;  %s248_s1 = sshll.u32 %s399_s0, 4  ;;  %s249_s1 = int_to_ptr.vmem [resolvable:$true] %s248_s1 }
   0xe   :  { %112 = vmatpush.msra.mxu0 %v111_v0  ;;  %264 = vmatpush.msra.mxu1 %v111_v0  ;;  %v106_v5 = vld [vmem:[#allocation6 + $0x50] sm:$0xff]  ;;  %v105_v6 = vld [vmem:[#allocation6 + $0x48] sm:$0xff]  ;;  %v104_v7 = vld [vmem:[#allocation6 + $0x40] sm:$0xff] }
   0xf   :  { %268 = vmatpush.msra.mxu2 %v110_v1  ;;  %269 = vmatpush.msra.mxu3 %v110_v1  ;;  %v103_v8 = vld [vmem:[#allocation6 + $0x38] sm:$0xff]  ;;  %v102_v9 = vld [vmem:[#allocation6 + $0x30] sm:$0xff]  ;;  %v101_v10 = vld [vmem:[#allocation6 + $0x28] sm:$0xff] }
  0x10   :  { %113 = vmatpush.msra.mxu0 %v110_v1  ;;  %267 = vmatpush.msra.mxu1 %v110_v1  ;;  %v100_v11 = vld [vmem:[#allocation6 + $0x20] sm:$0xff]  ;;  %v99_v12 = vld [vmem:[#allocation6 + $0x18] sm:$0xff]  ;;  %v98_v13 = vld [vmem:[#allocation6 + $0x10] sm:$0xff] }
  0x11   :  { %271 = vmatpush.msra.mxu2 %v109_v2  ;;  %272 = vmatpush.msra.mxu3 %v109_v2  ;;  %v97_v14 = vld [vmem:[#allocation6 + $0x8] sm:$0xff]  ;;  %v96_v15 = vld [vmem:[#allocation6] sm:$0xff]  ;;  %v90_v24 = vld [vmem:[#allocation3 + $0x50] sm:$0xff] }
  0x12   :  { %114 = vmatpush.msra.mxu0 %v109_v2  ;;  %270 = vmatpush.msra.mxu1 %v109_v2  ;;  %v88_v16 = vld [vmem:[#allocation3 + $0x40] sm:$0xff]  ;;  %v89_v20 = vld [vmem:[#allocation3 + $0x48] sm:$0xff]  ;;  %v94_v25 = vld [vmem:[#allocation3 + $0x70] sm:$0xff] }
  0x13   :  { %274 = vmatpush.msra.mxu2 %v108_v3  ;;  %275 = vmatpush.msra.mxu3 %v108_v3  ;;  %v92_v17 = vld [vmem:[#allocation3 + $0x60] sm:$0xff]  ;;  %v93_v21 = vld [vmem:[#allocation3 + $0x68] sm:$0xff]  ;;  %v82_v26 = vld [vmem:[#allocation3 + $0x10] sm:$0xff] }
  0x14   :  { %115 = vmatpush.msra.mxu0 %v108_v3  ;;  %273 = vmatpush.msra.mxu1 %v108_v3  ;;  %v80_v18 = vld [vmem:[#allocation3] sm:$0xff]  ;;  %v81_v22 = vld [vmem:[#allocation3 + $0x8] sm:$0xff]  ;;  %v86_v27 = vld [vmem:[#allocation3 + $0x30] sm:$0xff] }
  0x15   :  { %277 = vmatpush.msra.mxu2 %v107_v4  ;;  %278 = vmatpush.msra.mxu3 %v107_v4  ;;  %v84_v19 = vld [vmem:[#allocation3 + $0x20] sm:$0xff]  ;;  %v85_v23 = vld [vmem:[#allocation3 + $0x28] sm:$0xff]  ;;  %v91_v28 = vld [vmem:[#allocation3 + $0x58] sm:$0xff] }
  0x16   :  { %116 = vmatpush.msra.mxu0 %v107_v4  ;;  %276 = vmatpush.msra.mxu1 %v107_v4  ;;  %v95_v29 = vld [vmem:[#allocation3 + $0x78] sm:$0xff] }
  0x17   :  { %280 = vmatpush.msra.mxu2 %v106_v5  ;;  %281 = vmatpush.msra.mxu3 %v106_v5  ;;  %v83_v30 = vld [vmem:[#allocation3 + $0x18] sm:$0xff] }
  0x18   :  { %117 = vmatpush.msra.mxu0 %v106_v5  ;;  %279 = vmatpush.msra.mxu1 %v106_v5  ;;  %v87_v31 = vld [vmem:[#allocation3 + $0x38] sm:$0xff] }
  0x19   :  { %283 = vmatpush.msra.mxu2 %v105_v6  ;;  %284 = vmatpush.msra.mxu3 %v105_v6 }
  0x1a   :  { %118 = vmatpush.msra.mxu0 %v105_v6  ;;  %282 = vmatpush.msra.mxu1 %v105_v6 }
  0x1b   :  { %286 = vmatpush.msra.mxu2 %v104_v7  ;;  %287 = vmatpush.msra.mxu3 %v104_v7 }
  0x1c   :  { %119 = vmatpush.msra.mxu0 %v104_v7  ;;  %285 = vmatpush.msra.mxu1 %v104_v7 }
  0x1d   :  { %289 = vmatpush.msra.mxu2 %v103_v8  ;;  %290 = vmatpush.msra.mxu3 %v103_v8 }
  0x1e   :  { %120 = vmatpush.msra.mxu0 %v103_v8  ;;  %288 = vmatpush.msra.mxu1 %v103_v8 }
  0x1f   :  { %292 = vmatpush.msra.mxu2 %v102_v9  ;;  %293 = vmatpush.msra.mxu3 %v102_v9 }
  0x20   :  { %121 = vmatpush.msra.mxu0 %v102_v9  ;;  %291 = vmatpush.msra.mxu1 %v102_v9 }
  0x21   :  { %295 = vmatpush.msra.mxu2 %v101_v10  ;;  %296 = vmatpush.msra.mxu3 %v101_v10 }
  0x22   :  { %122 = vmatpush.msra.mxu0 %v101_v10  ;;  %294 = vmatpush.msra.mxu1 %v101_v10 }
  0x23   :  { %298 = vmatpush.msra.mxu2 %v100_v11  ;;  %299 = vmatpush.msra.mxu3 %v100_v11 }
  0x24   :  { %123 = vmatpush.msra.mxu0 %v100_v11  ;;  %297 = vmatpush.msra.mxu1 %v100_v11 }
  0x25   :  { %301 = vmatpush.msra.mxu2 %v99_v12  ;;  %302 = vmatpush.msra.mxu3 %v99_v12 }
  0x26   :  { %124 = vmatpush.msra.mxu0 %v99_v12  ;;  %300 = vmatpush.msra.mxu1 %v99_v12 }
  0x27   :  { %304 = vmatpush.msra.mxu2 %v98_v13  ;;  %305 = vmatpush.msra.mxu3 %v98_v13 }
  0x28   :  { %125 = vmatpush.msra.mxu0 %v98_v13  ;;  %303 = vmatpush.msra.mxu1 %v98_v13 }
  0x29   :  { %307 = vmatpush.msra.mxu2 %v97_v14  ;;  %308 = vmatpush.msra.mxu3 %v97_v14 }
  0x2a   :  { %126 = vmatpush.msra.mxu0 %v97_v14  ;;  %306 = vmatpush.msra.mxu1 %v97_v14 }
  0x2b   :  { %310 = vmatpush.msra.mxu2 %v96_v15  ;;  %311 = vmatpush.msra.mxu3 %v96_v15 }
  0x2c   :  { %152 = vmatmul.f32.vlgmr.msra.gmra.mxu2 %v88_v16  ;;  %164 = vmatmul.f32.vlgmr.msra.gmra.mxu3 %v92_v17 }
  0x2d   :  { %127 = vmatpush.msra.mxu0 %v96_v15  ;;  %309 = vmatpush.msra.mxu1 %v96_v15 }
  0x2e   :  { %128 = vmatmul.f32.vlgmr.msra.gmra.mxu0 %v80_v18  ;;  %140 = vmatmul.f32.vlgmr.msra.gmra.mxu1 %v84_v19 }
  0x34   :  { %155 = vmatmul.f32.gmra.mxu2 %v89_v20  ;;  %167 = vmatmul.f32.gmra.mxu3 %v93_v21 }
  0x36   :  { %131 = vmatmul.f32.gmra.mxu0 %v81_v22  ;;  %143 = vmatmul.f32.gmra.mxu1 %v85_v23 }
  0x3c   :  { %158 = vmatmul.f32.gmra.mxu2 %v90_v24  ;;  %170 = vmatmul.f32.gmra.mxu3 %v94_v25 }
  0x3e   :  { %134 = vmatmul.f32.gmra.mxu0 %v82_v26  ;;  %146 = vmatmul.f32.gmra.mxu1 %v86_v27 }
  0x44   :  { %161 = vmatmul.f32.gmra.mxu2 %v91_v28  ;;  %173 = vmatmul.f32.gmra.mxu3 %v95_v29 }
  0x46   :  { %137 = vmatmul.f32.gmra.mxu0 %v83_v30  ;;  %149 = vmatmul.f32.gmra.mxu1 %v87_v31 }
  0xab   :  { %v129_v32 = vpop.f32.mrf.mxu0  ;;  %v141_v33 = vpop.f32.mrf.mxu1 }
  0xac   :  { %228 = vst [vmem:[#allocation8] sm:$0xff] %v129_v32 }
  0xad   :  { %232 = vst [vmem:[#allocation8 + $0x20] sm:$0xff] %v141_v33 }
  0xaf   :  { %v153_v34 = vpop.f32.mrf.mxu2  ;;  %v165_v35 = vpop.f32.mrf.mxu3 }
  0xb0   :  { %236 = vst [vmem:[#allocation8 + $0x40] sm:$0xff] %v153_v34 }
  0xb1   :  { %240 = vst [vmem:[#allocation8 + $0x60] sm:$0xff] %v165_v35 }
  0xb3   :  { %v132_v36 = vpop.f32.mrf.mxu0  ;;  %v144_v37 = vpop.f32.mrf.mxu1 }
  0xb4   :  { %229 = vst [vmem:[#allocation8 + $0x8] sm:$0xff] %v132_v36 }
  0xb5   :  { %233 = vst [vmem:[#allocation8 + $0x28] sm:$0xff] %v144_v37 }
  0xb7   :  { %v156_v38 = vpop.f32.mrf.mxu2  ;;  %v168_v39 = vpop.f32.mrf.mxu3 }
  0xb8   :  { %237 = vst [vmem:[#allocation8 + $0x48] sm:$0xff] %v156_v38 }
  0xb9   :  { %241 = vst [vmem:[#allocation8 + $0x68] sm:$0xff] %v168_v39 }
  0xbb   :  { %v135_v40 = vpop.f32.mrf.mxu0  ;;  %v147_v41 = vpop.f32.mrf.mxu1 }
  0xbc   :  { %230 = vst [vmem:[#allocation8 + $0x10] sm:$0xff] %v135_v40 }
  0xbd   :  { %234 = vst [vmem:[#allocation8 + $0x30] sm:$0xff] %v147_v41 }
  0xbf   :  { %v159_v42 = vpop.f32.mrf.mxu2  ;;  %v171_v43 = vpop.f32.mrf.mxu3 }
  0xc0   :  { %238 = vst [vmem:[#allocation8 + $0x50] sm:$0xff] %v159_v42 }
  0xc1   :  { %242 = vst [vmem:[#allocation8 + $0x70] sm:$0xff] %v171_v43 }
  0xc3   :  { %v138_v44 = vpop.f32.mrf.mxu0  ;;  %v150_v45 = vpop.f32.mrf.mxu1 }
  0xc4   :  { %231 = vst [vmem:[#allocation8 + $0x18] sm:$0xff] %v138_v44 }
  0xc5   :  { %235 = vst [vmem:[#allocation8 + $0x38] sm:$0xff] %v150_v45 }
  0xc7   :  { %v162_v46 = vpop.f32.mrf.mxu2  ;;  %v174_v47 = vpop.f32.mrf.mxu3 }
  0xc8   :  { %239 = vst [vmem:[#allocation8 + $0x58] sm:$0xff] %v162_v46 }
  0xc9   :  { %243 = vst [vmem:[#allocation8 + $0x78] sm:$0xff] %v174_v47 }
  0xca   :  { %256 = dma.vmem_to_hbm [thread:$0]  %s249_s1, 2048, %s251_s23, [#allocation5], %s396_s17, %s396_s17, %s397_s18  }
  0xcb   :  { %393 = dma.done.wait [#allocation5], 2048  }
  0xcc   :  { %394 = vsyncadd [#allocation5], 4294965248 }
  0xcd   :  { %261 = vsyncpa [#allocation4], 1 }
  0xce   :  { %262 = vsyncpa [#allocation7], 1 }
  0xcf   :  { %263 = vsyncpa [#allocation5], 1 }

</bundles_post_ra>
